<compile_context>
chip_gen: v5e
topology: v5e:2x2
jax: 0.10.0
libtpu: 0.0.40
codegen_flags: <defaults>
</compile_context>

<pallas_src>
import functools

import jax
import jax.numpy as jnp
from jax.experimental import pallas as pl
from jax.experimental.pallas import tpu as pltpu


# ---------------------------------------------------------------------------
# Kernel A: tiny 3-layer MLP head (Linear+ReLU x3).  Runs once, no grid.
# Total weights < 10 KB, so everything lives as whole-array VMEM blocks.
# ---------------------------------------------------------------------------
def decoder_head_kernel(z_ref, w1_ref, b1_ref, w2_ref, b2_ref, w3_ref, b3_ref,
                        h_ref):
    h = jnp.dot(z_ref[...], w1_ref[...], preferred_element_type=jnp.float32)
    h = jnp.maximum(h + b1_ref[...], 0.0)

    h = jnp.dot(h, w2_ref[...], preferred_element_type=jnp.float32)
    h = jnp.maximum(h + b2_ref[...], 0.0)

    h = jnp.dot(h, w3_ref[...], preferred_element_type=jnp.float32)
    h = jnp.maximum(h + b3_ref[...], 0.0)

    # bf16 activations feed the bf16 W4 matmul (f32 MXU accumulation).
    h_ref[...] = h.astype(h_ref.dtype)


# ---------------------------------------------------------------------------
# Kernel B: final wide Linear+ReLU, streamed over output-column tiles.
# Each grid step is independent (parallel-safe on multi-TensorCore chips).
# ---------------------------------------------------------------------------
def decoder_out_kernel(h_ref, w4_ref, b4_ref, out_ref):
    acc = jnp.dot(h_ref[...], w4_ref[...], preferred_element_type=jnp.float32)
    out_ref[...] = jnp.maximum(acc + b4_ref[...], 0.0)


# ---------------------------------------------------------------------------
# One-time parameter prep (host side, NOT part of the per-call forward):
# pad W4/b4 on the lane axis to a multiple of the tile width and cast W4 to
# bf16 so the dominant HBM stream is halved.
# ---------------------------------------------------------------------------
def prepare_params(params, *, tn=4608):
    (w1, b1), (w2, b2), (w3, b3), (w4, b4) = params
    hidden_dim, out_dim = w4.shape
    assert tn % 128 == 0, "tile width must be a multiple of 128 lanes"
    out_pad = pl.cdiv(out_dim, tn) * tn        # 9000 -> 9216 for tn=4608
    w4_p = jnp.zeros((hidden_dim, out_pad), jnp.bfloat16)
    w4_p = w4_p.at[:, :out_dim].set(w4.astype(jnp.bfloat16))
    b4_p = jnp.zeros((1, out_pad), jnp.float32).at[:, :out_dim].set(b4)
    return ((w1, b1), (w2, b2), (w3, b3), (w4_p, b4_p))


@functools.partial(jax.jit, static_argnames=("num_classes", "h", "w", "tn"))
def decoder_forward(z, prepared_params, *, num_classes=10, h=30, w=30, tn=4608):
    """z: (B, latent_dim) -> (B, num_classes, h, w), float32."""
    (w1, b1), (w2, b2), (w3, b3), (w4_p, b4_p) = prepared_params
    B, latent_dim = z.shape
    hidden_dim = w3.shape[1]
    out_dim = num_classes * h * w
    out_pad = w4_p.shape[1]
    assert out_pad % tn == 0 and out_pad >= out_dim
    n_tiles = out_pad // tn                    # 2 tiles -> even split on v7x
    b_pad = ((B + 7) // 8) * 8                 # sublane-pad batch (2 -> 8)

    z_pad = jnp.zeros((b_pad, latent_dim), jnp.float32).at[:B, :].set(z)

    # ---- layers 1-3: run once (no recompute per grid step) ------------------
    hid = pl.pallas_call(
        decoder_head_kernel,
        out_shape=jax.ShapeDtypeStruct((b_pad, hidden_dim), jnp.bfloat16),
    )(z_pad, w1, b1, w2, b2, w3, b3)

    # ---- layer 4: stream W4 column tiles, double-buffered DMA ---------------
    flat = pl.pallas_call(
        decoder_out_kernel,
        out_shape=jax.ShapeDtypeStruct((b_pad, out_pad), jnp.float32),
        grid=(n_tiles,),
        in_specs=[
            pl.BlockSpec((b_pad, hidden_dim), lambda j: (0, 0)),
            pl.BlockSpec((hidden_dim, tn), lambda j: (0, j)),
            pl.BlockSpec((1, tn), lambda j: (0, j)),
        ],
        out_specs=pl.BlockSpec((b_pad, tn), lambda j: (0, j)),
        compiler_params=pltpu.CompilerParams(
            dimension_semantics=("parallel",)),
    )(hid, w4_p, b4_p)

    # Drop batch/lane padding, then nn.Unflatten(1, (num_classes, h, w)).
    return flat[:B, :out_dim].reshape(B, num_classes, h, w)


def init_params(key, latent_dim=20, hidden_dim=32, num_classes=10,
                output_dim=30 * 30):
    """Deterministic synthetic f32 params (shapes match the PyTorch module)."""
    dims = [(latent_dim, hidden_dim),
            (hidden_dim, hidden_dim),
            (hidden_dim, hidden_dim),
            (hidden_dim, num_classes * output_dim)]
    params = []
    for fan_in, fan_out in dims:
        kw, kb, key = jax.random.split(key, 3)
        bound = 1.0 / jnp.sqrt(jnp.float32(fan_in))  # PyTorch default scale
        # Weight stored as (in, out) so the kernel does z @ W (== PyTorch z @ W.T).
        W = jax.random.uniform(kw, (fan_in, fan_out), jnp.float32, -bound, bound)
        b = jax.random.uniform(kb, (1, fan_out), jnp.float32, -bound, bound)
        params.append((W, b))
    return params


def decoder_ref(z, params, *, num_classes=10, h=30, w=30):
    """Pure f32 JAX reference (kernel uses bf16 W4/h -> compare loosely)."""
    x = z
    for W, b in params:
        x = jnp.maximum(x @ W + b, 0.0)
    return x.reshape(z.shape[0], num_classes, h, w)


if __name__ == "__main__":
    latent_dim, hidden_dim, num_classes, output_dim = 20, 32, 10, 30 * 30
    B = 2

    key = jax.random.PRNGKey(0)
    kz, kp = jax.random.split(key)
    z = jax.random.normal(kz, (B, latent_dim), jnp.float32)
    params = init_params(kp, latent_dim, hidden_dim, num_classes, output_dim)

    # One-time prep (pad + bf16 cast of W4) kept out of the forward path.
    prepared = prepare_params(params, tn=4608)

    out = decoder_forward(z, prepared, num_classes=num_classes, h=30, w=30,
                          tn=4608)
    out = jax.block_until_ready(out)

    ref = decoder_ref(z, params, num_classes=num_classes, h=30, w=30)
    assert out.shape == (B, num_classes, 30, 30), out.shape
    # bf16 W4 + bf16 layer-3 activations -> loose tolerance vs f32 reference.
    assert jnp.allclose(out, ref, atol=3e-2, rtol=3e-2), "mismatch vs JAX reference"

    print("KERNEL_OK")
</pallas_src>

<mosaic_0001>
module attributes {stable_mosaic.version = 11 : i64} {
  func.func @decoder_head_kernel(%arg0: memref<8x20xf32, #tpu.memory_space<vmem>>, %arg1: memref<20x32xf32, #tpu.memory_space<vmem>>, %arg2: memref<1x32xf32, #tpu.memory_space<vmem>>, %arg3: memref<32x32xf32, #tpu.memory_space<vmem>>, %arg4: memref<1x32xf32, #tpu.memory_space<vmem>>, %arg5: memref<32x32xf32, #tpu.memory_space<vmem>>, %arg6: memref<1x32xf32, #tpu.memory_space<vmem>>, %arg7: memref<8x32xbf16, #tpu.memory_space<vmem>>) attributes {dimension_semantics = [], scalar_prefetch = 0 : i64, scratch_operands = 0 : i64, tpu.core_type = #tpu.core_type<tc>} {
    %c0 = arith.constant 0 : index
    %c0_0 = arith.constant 0 : index
    %0 = vector.load %arg0[%c0, %c0_0] : memref<8x20xf32, #tpu.memory_space<vmem>>, vector<8x20xf32>
    %c0_1 = arith.constant 0 : index
    %c0_2 = arith.constant 0 : index
    %1 = vector.load %arg1[%c0_1, %c0_2] : memref<20x32xf32, #tpu.memory_space<vmem>>, vector<20x32xf32>
    %cst = arith.constant dense<0.000000e+00> : vector<8x32xf32>
    %2 = tpu.matmul %0, %1, %cst {dimension_numbers = #tpu.dot_dimension_numbers<[1], [0], [0], [1], [0, 0, 1, 1], [], []>} : vector<8x20xf32>, vector<20x32xf32>, vector<8x32xf32> -> vector<8x32xf32>
    %c0_3 = arith.constant 0 : index
    %c0_4 = arith.constant 0 : index
    %3 = vector.load %arg2[%c0_3, %c0_4] : memref<1x32xf32, #tpu.memory_space<vmem>>, vector<1x32xf32>
    %4 = vector.broadcast %3 : vector<1x32xf32> to vector<8x32xf32>
    %5 = arith.addf %2, %4 : vector<8x32xf32>
    %cst_5 = arith.constant 0.000000e+00 : f32
    %6 = vector.broadcast %cst_5 : f32 to vector<8x32xf32>
    %7 = arith.maximumf %5, %6 : vector<8x32xf32>
    %c0_6 = arith.constant 0 : index
    %c0_7 = arith.constant 0 : index
    %8 = vector.load %arg3[%c0_6, %c0_7] : memref<32x32xf32, #tpu.memory_space<vmem>>, vector<32x32xf32>
    %cst_8 = arith.constant dense<0.000000e+00> : vector<8x32xf32>
    %9 = tpu.matmul %7, %8, %cst_8 {dimension_numbers = #tpu.dot_dimension_numbers<[1], [0], [0], [1], [0, 0, 1, 1], [], []>} : vector<8x32xf32>, vector<32x32xf32>, vector<8x32xf32> -> vector<8x32xf32>
    %c0_9 = arith.constant 0 : index
    %c0_10 = arith.constant 0 : index
    %10 = vector.load %arg4[%c0_9, %c0_10] : memref<1x32xf32, #tpu.memory_space<vmem>>, vector<1x32xf32>
    %11 = vector.broadcast %10 : vector<1x32xf32> to vector<8x32xf32>
    %12 = arith.addf %9, %11 : vector<8x32xf32>
    %cst_11 = arith.constant 0.000000e+00 : f32
    %13 = vector.broadcast %cst_11 : f32 to vector<8x32xf32>
    %14 = arith.maximumf %12, %13 : vector<8x32xf32>
    %c0_12 = arith.constant 0 : index
    %c0_13 = arith.constant 0 : index
    %15 = vector.load %arg5[%c0_12, %c0_13] : memref<32x32xf32, #tpu.memory_space<vmem>>, vector<32x32xf32>
    %cst_14 = arith.constant dense<0.000000e+00> : vector<8x32xf32>
    %16 = tpu.matmul %14, %15, %cst_14 {dimension_numbers = #tpu.dot_dimension_numbers<[1], [0], [0], [1], [0, 0, 1, 1], [], []>} : vector<8x32xf32>, vector<32x32xf32>, vector<8x32xf32> -> vector<8x32xf32>
    %c0_15 = arith.constant 0 : index
    %c0_16 = arith.constant 0 : index
    %17 = vector.load %arg6[%c0_15, %c0_16] : memref<1x32xf32, #tpu.memory_space<vmem>>, vector<1x32xf32>
    %18 = vector.broadcast %17 : vector<1x32xf32> to vector<8x32xf32>
    %19 = arith.addf %16, %18 : vector<8x32xf32>
    %cst_17 = arith.constant 0.000000e+00 : f32
    %20 = vector.broadcast %cst_17 : f32 to vector<8x32xf32>
    %21 = arith.maximumf %19, %20 : vector<8x32xf32>
    %22 = arith.truncf %21 : vector<8x32xf32> to vector<8x32xbf16>
    %c0_18 = arith.constant 0 : index
    %c0_19 = arith.constant 0 : index
    %23 = vector.load %arg7[%c0_18, %c0_19] : memref<8x32xbf16, #tpu.memory_space<vmem>>, vector<8x32xbf16>
    tpu.vector_store %arg7[%c0_18, %c0_19], %22 {strides = array<i32>} : memref<8x32xbf16, #tpu.memory_space<vmem>>, vector<8x32xbf16>,
    return
  }
}

module attributes {stable_mosaic.version = 11 : i64} {
  func.func @decoder_out_kernel(%arg0: i32, %arg1: memref<8x32xbf16, #tpu.memory_space<vmem>>, %arg2: memref<32x4608xbf16, #tpu.memory_space<vmem>>, %arg3: memref<1x4608xf32, #tpu.memory_space<vmem>>, %arg4: memref<8x4608xf32, #tpu.memory_space<vmem>>) attributes {dimension_semantics = [#tpu.dimension_semantics<parallel>], iteration_bounds = array<i64: 2>, scalar_prefetch = 0 : i64, scratch_operands = 0 : i64, tpu.core_type = #tpu.core_type<tc>, window_params = [{pipeline_mode = #tpu.pipeline_mode<synchronous>, transform_indices = @transform_0, window_bounds = array<i64: 8, 32>}, {transform_indices = @transform_1, window_bounds = array<i64: 32, 4608>}, {transform_indices = @transform_2, window_bounds = array<i64: 1, 4608>}, {transform_indices = @transform_3, window_bounds = array<i64: 8, 4608>}]} {
    %c0 = arith.constant 0 : index
    %c0_0 = arith.constant 0 : index
    %0 = vector.load %arg1[%c0, %c0_0] : memref<8x32xbf16, #tpu.memory_space<vmem>>, vector<8x32xbf16>
    %c0_1 = arith.constant 0 : index
    %c0_2 = arith.constant 0 : index
    %1 = vector.load %arg2[%c0_1, %c0_2] : memref<32x4608xbf16, #tpu.memory_space<vmem>>, vector<32x4608xbf16>
    %cst = arith.constant dense<0.000000e+00> : vector<8x4608xf32>
    %2 = tpu.matmul %0, %1, %cst {dimension_numbers = #tpu.dot_dimension_numbers<[1], [0], [0], [1], [0, 0, 1, 1], [], []>} : vector<8x32xbf16>, vector<32x4608xbf16>, vector<8x4608xf32> -> vector<8x4608xf32>
    %c0_3 = arith.constant 0 : index
    %c0_4 = arith.constant 0 : index
    %3 = vector.load %arg3[%c0_3, %c0_4] : memref<1x4608xf32, #tpu.memory_space<vmem>>, vector<1x4608xf32>
    %4 = vector.broadcast %3 : vector<1x4608xf32> to vector<8x4608xf32>
    %5 = arith.addf %2, %4 : vector<8x4608xf32>
    %cst_5 = arith.constant 0.000000e+00 : f32
    %6 = vector.broadcast %cst_5 : f32 to vector<8x4608xf32>
    %7 = arith.maximumf %5, %6 : vector<8x4608xf32>
    %c0_6 = arith.constant 0 : index
    %c0_7 = arith.constant 0 : index
    %8 = vector.load %arg4[%c0_6, %c0_7] : memref<8x4608xf32, #tpu.memory_space<vmem>>, vector<8x4608xf32>
    tpu.vector_store %arg4[%c0_6, %c0_7], %7 {strides = array<i32>} : memref<8x4608xf32, #tpu.memory_space<vmem>>, vector<8x4608xf32>,
    return
  }
  func.func @transform_0(%arg0: i32) -> (i32, i32) {
    %c0_i32 = arith.constant 0 : i32
    %c0_i32_0 = arith.constant 0 : i32
    %c0_i32_1 = arith.constant 0 : i32
    return %c0_i32, %c0_i32_0 : i32, i32
  }
  func.func @transform_1(%arg0: i32) -> (i32, i32) {
    %c0_i32 = arith.constant 0 : i32
    %c0_i32_0 = arith.constant 0 : i32
    return %c0_i32, %arg0 : i32, i32
  }
  func.func @transform_2(%arg0: i32) -> (i32, i32) {
    %c0_i32 = arith.constant 0 : i32
    %c0_i32_0 = arith.constant 0 : i32
    return %c0_i32, %arg0 : i32, i32
  }
  func.func @transform_3(%arg0: i32) -> (i32, i32) {
    %c0_i32 = arith.constant 0 : i32
    %c0_i32_0 = arith.constant 0 : i32
    return %c0_i32, %arg0 : i32, i32
  }
}

</mosaic_0001>

<bundles_post_ra>
// kernel: decoder_forward.2
= control target key start
LH: loop header
LB: loop body
LE: loop exit
PB: predicated region body
PF: predicated region fallthrough
CT: control target
= control target key end

     0   :  { %12 = vsyncpa [#allocation3], 0  ;;  %s341_s0 = inlined_call_operand.vmem [shape: f32[8,20], index: 0, kind: input, shape index: {}]   ;;  %s342_s1 = inlined_call_operand.hbm [shape: f32[20,32], index: 1, kind: input, shape index: {}]   ;;  %s343_s2 = inlined_call_operand.vmem [shape: f32[1,32], index: 2, kind: input, shape index: {}]   ;;  %s344_s3 = inlined_call_operand.hbm [shape: f32[32,32], index: 3, kind: input, shape index: {}]   ;;  %s345_s4 = inlined_call_operand.vmem [shape: f32[1,32], index: 4, kind: input, shape index: {}]   ;;  %s346_s5 = inlined_call_operand.hbm [shape: f32[32,32], index: 5, kind: input, shape index: {}]   ;;  %s347_s6 = inlined_call_operand.vmem [shape: f32[1,32], index: 6, kind: input, shape index: {}]   ;;  %s348_s7 = inlined_call_operand.vmem [shape: bf16[8,32], index: 7, kind: output, shape index: {}]  }
   0x1   :  { %13 = vsyncpa [#allocation5], 0  ;;  %s35_s26 = sshll.u32 %s344_s3, 4  ;;  %s272_s27 = smov [#allocation4]   ;;  %s36_s26 = int_to_ptr.hbm [resolvable:$true] %s35_s26 }
   0x2   :  { %s37_s28 = sshll.u32 %s272_s27, 4  ;;  %s20_s8 = sshll.u32 %s342_s1, 4  ;;  %s38_s28 = int_to_ptr.vmem [resolvable:$true] %s37_s28  ;;  %s21_s8 = int_to_ptr.hbm [resolvable:$true] %s20_s8 }
   0x3   :  { %s273_s9 = smov 128   ;;  %s274_s10 = smov 8  }
   0x4   :  { %43 = dma.hbm_to_vmem [thread:$0]  %s36_s26, 512, %s38_s28, [#allocation5], %s273_s9, %s273_s9, %s274_s10  }
   0x5   :  { %s275_s11 = smov [#allocation2]   ;;  %s50_s15 = sshll.u32 %s346_s5, 4  ;;  %s51_s15 = int_to_ptr.hbm [resolvable:$true] %s50_s15 }
   0x6   :  { %s22_s12 = sshll.u32 %s275_s11, 4  ;;  %s276_s3 = smov [#allocation6]   ;;  %s23_s12 = int_to_ptr.vmem [resolvable:$true] %s22_s12 }
   0x7   :  { %28 = dma.hbm_to_vmem [thread:$0]  %s21_s8, 384, %s23_s12, [#allocation3], %s273_s9, %s273_s9, %s274_s10  }
   0x8   :  { %s52_s16 = sshll.u32 %s276_s3, 4  ;;  %s53_s16 = int_to_ptr.vmem [resolvable:$true] %s52_s16 }
   0x9   :  { %58 = dma.hbm_to_vmem [thread:$0]  %s51_s15, 512, %s53_s16, [#allocation5], %s273_s9, %s273_s9, %s274_s10  }
   0xa   :  { %268 = dma.done.wait [#allocation3], 384  }
   0xb   :  { %269 = vsyncadd [#allocation3], 4294966912 }
   0xc   :  { %270 = dma.done.wait [#allocation5], 1024  }
   0xd   :  { %271 = vsyncadd [#allocation5], 4294966272  ;;  %vm85_vm0 = vcmask 1043456   ;;  %v76_v0 = vld [vmem:[#allocation2 + $0x10] sm:$0xf]  ;;  %v75_v1 = vld [vmem:[#allocation2 + $0x8] sm:$0xff] }
   0xe   :  { %184 = vmatpush.msk.msra.mxu0 %vm85_vm0, %v76_v0  ;;  %v113_v2 = vld [vmem:[#allocation4 + $0x18] sm:$0xff]  ;;  %v74_v3 = vld [vmem:[#allocation2] sm:$0xff]  ;;  %vm81_vm1 = vcmask 162816   ;;  %v112_v5 = vld [vmem:[#allocation4 + $0x10] sm:$0xff]  ;;  %vm118_vm2 = vcmask 261120   ;;  %vm176_vm3 = vcmask 257024  }
   0xf   :  { %134 = vmatpush.msra.mxu1 %v113_v2  ;;  %v73_v4 = vld [vmem:[%s341_s0] sm:$0xff]  ;;  %v110_v7 = vld [vmem:[#allocation4] sm:$0xff]  ;;  %v146_v8 = vld [vmem:[#allocation6 + $0x18] sm:$0xff] }
  0x10   :  { %103 = vmatpush.msra.mxu0 %v75_v1  ;;  %v111_v6 = vld [vmem:[#allocation4 + $0x8] sm:$0xff]  ;;  %166 = vmatpush.msra.mxu2 %v146_v8  ;;  %v145_v13 = vld [vmem:[#allocation6 + $0x10] sm:$0xff]  ;;  %v143_v15 = vld [vmem:[#allocation6] sm:$0xff] }
  0x11   :  { %135 = vmatpush.msra.mxu1 %v112_v5  ;;  %v193_v9 = vld [vmem:[%s343_s2] ss:$0 sm:$0xff] }
  0x12   :  { %104 = vmatpush.msra.mxu0 %v74_v3  ;;  %167 = vmatpush.msra.mxu2 %v145_v13  ;;  %v144_v14 = vld [vmem:[#allocation6 + $0x8] sm:$0xff] }
  0x13   :  { %185 = vmatmul.msk.f32.vlgmr.msra.gmra.mxu0 %vm81_vm1, %v73_v4  ;;  %136 = vmatpush.msra.mxu1 %v111_v6  ;;  %v194_v16 = vld [vmem:[%s345_s4] ss:$0 sm:$0xff] }
  0x14   :  { %168 = vmatpush.msra.mxu2 %v144_v14  ;;  %v195_v20 = vld [vmem:[%s347_s6] ss:$0 sm:$0xff] }
  0x15   :  { %137 = vmatpush.msra.mxu1 %v110_v7 }
  0x16   :  { %169 = vmatpush.msra.mxu2 %v143_v15 }
  0x90   :  { %v106_v10 = vpop.f32.mrf.mxu0 }
  0x91   :  { %v107_v11 = vadd.f32 %v193_v9, %v106_v10 }
  0x93   :  { %v109_v12 = vmax.f32 %v107_v11, 0.0 }
  0x95   :  { %186 = vmatmul.msk.f32.vlgmr.msra.gmra.mxu1 %vm118_vm2, %v109_v12 }
 0x112   :  { %v139_v17 = vpop.f32.mrf.mxu1 }
 0x113   :  { %v140_v18 = vadd.f32 %v194_v16, %v139_v17 }
 0x115   :  { %v142_v19 = vmax.f32 %v140_v18, 0.0 }
 0x117   :  { %187 = vmatmul.msk.f32.vlgmr.msra.gmra.mxu2 %vm118_vm2, %v142_v19 }
 0x19a   :  { %v171_v21 = vpop.f32.mrf.mxu2 }
 0x19b   :  { %v172_v22 = vadd.f32 %v195_v20, %v171_v21 }
 0x19d   :  { %v174_v23 = vmax.f32 %v172_v22, 0.0 }
 0x19f   :  { %v175_v24 = vpack.c.bf16 %v174_v23, %v174_v23 }
 0x1a1   :  { %177 = vst.msk [vmem:[%s348_s7] sm:$0xf] %vm176_vm3, %v175_v24 }
 0x1a2   :  { %182 = vsyncpa [#allocation3], 1 }
 0x1a3   :  { %183 = vsyncpa [#allocation5], 1 }

// kernel: decoder_forward.3
= control target key start
LH: loop header
LB: loop body
LE: loop exit
PB: predicated region body
PF: predicated region fallthrough
CT: control target
= control target key end

     0   :  { %8 = vsyncpa [#allocation3], 0  ;;  %s2350_s0 = inlined_call_operand.vmem [shape: bf16[8,32], index: 0, kind: input, shape index: {}]   ;;  %s2351_s1 = inlined_call_operand.hbm [shape: bf16[32,9216], index: 1, kind: input, shape index: {}]   ;;  %s2352_s2 = inlined_call_operand.hbm [shape: f32[1,9216], index: 2, kind: input, shape index: {}]   ;;  %s2353_s3 = inlined_call_operand.vmem [shape: f32[8,9216], index: 3, kind: output, shape index: {}]  }
   0x1   :  { %10 = vsyncpa [#allocation3 + $0x1], 0 }
   0x2   :  { %11 = vsyncpa [#allocation5], 0 }
   0x3   :  { %13 = vsyncpa [#allocation5 + $0x1], 0  ;;  %s1965_s12 = smov 0   ;;  %s1967_s13 = smov 0  }
   0x4   :  { %s1969_s14 = smov 0   ;;  %s1971_s15 = smov 0  }
   0x5 LB: > { %s1385_s16 = sadd.s32 4294967295, %s1940_s15   ;;  %s1985_s17 = sadd.s32 1, %s1940_s15   ;;  %s1940_s15 = sphi %s1971_s15, %s2360_s15   ;;  %s1936_s14 = sphi %s1969_s14, %s2359_s14   ;;  %s1932_s13 = sphi %s1967_s13, %s2358_s13   ;;  %s1928_s12 = sphi %s1965_s12, %s2357_s12  }
   0x6   : > { %s44_s18 = ssub.s32 %s1940_s15, %s1985_s17  ;;  %s47_s19 = sadd.s32 1, %s1936_s14 }
   0x7   : > { %p45_p0 = scmp.eq.s32.totalorder %s44_s18, 0  ;;  %p54_p1 = scmp.ne.s32.totalorder %s1936_s14, %s1932_s13 }
   0x8   : > { %p55_p2 = scmp.eq.s32.totalorder %s1940_s15, 0  ;;  %p60_p3 = scmp.ne.s32.totalorder %s1932_s13, %s1928_s12 }
   0x9   : > { %s1995_s20 = scalar_select %p45_p0, %s1936_s14, %s47_s19  }
   0xa   : > { %p56_p4 = por %p55_p2, %p54_p1  ;;  %p61_p5 = scmp.eq.s32.totalorder %s1385_s16, 0 }
   0xb   : > { %p1806_p6 = scmp.lt.s32.totalorder %s1940_s15, 2  ;;  %s2005_s22 = sand.u32 1, %s1936_s14  }
   0xc   : > { %p2000_p7 = por %p61_p5, %p60_p3  ;;  %s1791_s23 = smul.u32 576, %s2005_s22 }
   0xd   : > { %s1718_s24 = smul.u32 144, %s1940_s15  ;;  %p2009_p8 = pnand %p1806_p6, %p56_p4 }
   0xe   : > { %s143_s29 = scalar_lea.vmem [#allocation2], %s1791_s23  ;;  %s140_s5 = scalar_lea.sflag [#allocation3], %s2005_s22 }
   0xf   : > { %s148_s28 = scalar_lea.hbm %s2351_s1, %s1718_s24  ;;  %s151_s30 = sshll.u32 %s143_s29, 4  ;;  %s152_s30 = int_to_ptr.vmem [resolvable:$true] %s151_s30 }
  0x10   : > { %s149_s4 = sshll.u32 %s148_s28, 4  ;;  %p1846_p10 = pneg %p2009_p8  ;;  %s150_s4 = int_to_ptr.hbm [resolvable:$true] %s149_s4 }
  0x11   : > { %s1842_s6 = sshra.s32 %s150_s4, 4  ;;  %s1849_s10 = scalar_lea.hbm %s2351_s1, 1152  ;;  %s1843_s6 = int_to_ptr.hbm [resolvable:$true] %s1842_s6 }
  0x12   : > { %s1844_s7 = scalar_lea.hbm %s1843_s6, 576  ;;  %p1850_p13 = scmp.lt.s32.totalorder %s1843_s6, %s2351_s1 }
  0x13   : > { %p1845_p9 = scmp.ne.s32.totalorder %s1843_s6, %s1844_s7  ;;  %p1851_p0 = scmp.lt.s32.totalorder %s1849_s10, %s1844_s7 }
  0x15   : > { %p1847_p11 = pnand %p1846_p10, %p1845_p9  ;;  %p1852_p1 = por %p1851_p0, %p1850_p13 }
  0x17   : > { %p1848_p12 = pneg %p1847_p11 }
  0x19   : > { %p1853_p2 = pnand %p1852_p1, %p1848_p12 }
  0x1b   : > { %1856 = shalt.err (!%p1853_p2)
}
  0x1c   : > { %s1942_s18 = smov 4608   ;;  %s1943_s19 = smov 2304  }
  0x1d   : > { %s1944_s23 = smov 144   ;;  %p1390_p3 = scmp.ge.s32.totalorder %s1940_s15, 1 }
  0x1e   : > { %1802 = dma.hbm_to_vmem [thread:$0]  (!%p2009_p8), %s150_s4, 9216, %s152_s30, %s140_s5, %s1942_s18, %s1943_s19, %s1944_s23  }
  0x1f   : > { %p178_p4 = scmp.lt.s32.totalorder %s1940_s15, 3  ;;  %s1792_s24 = smul.u32 36, %s2005_s22 }
  0x20   : > { %s166_s27 = smul.u32 36, %s1940_s15  ;;  %s162_s10 = scalar_lea.sflag [#allocation5], %s2005_s22 }
  0x21   : > { %p2033_p5 = pnand %p1390_p3, %p178_p4  ;;  %s165_s7 = scalar_lea.vmem [#allocation4], %s1792_s24 }
  0x22   : > { %s169_s6 = scalar_lea.hbm %s2352_s2, %s166_s27  ;;  %s173_s8 = sshll.u32 %s165_s7, 4  ;;  %s174_s8 = int_to_ptr.vmem [resolvable:$true] %s173_s8 }
  0x23   : > { %s171_s9 = sshll.u32 %s169_s6, 4  ;;  %s1879_s12 = scalar_lea.hbm %s2352_s2, 72  ;;  %s172_s9 = int_to_ptr.hbm [resolvable:$true] %s171_s9 }
  0x24   : > { %s1872_s30 = sshra.s32 %s172_s9, 4  ;;  %s1873_s30 = int_to_ptr.hbm [resolvable:$true] %s1872_s30 }
  0x25   : > { %s1874_s4 = scalar_lea.hbm %s1873_s30, 36  ;;  %p1880_p12 = scmp.lt.s32.totalorder %s1873_s30, %s2352_s2 }
  0x26   : > { %p1875_p6 = scmp.ne.s32.totalorder %s1873_s30, %s1874_s4  ;;  %p1881_p13 = scmp.lt.s32.totalorder %s1879_s12, %s1874_s4 }
  0x28   : > { %p1877_p9 = pnand %p1875_p6, %p1846_p10  ;;  %p1882_p0 = por %p1881_p13, %p1880_p12 }
  0x2a   : > { %p1878_p11 = pneg %p1877_p9 }
  0x2c   : > { %p1883_p1 = pnand %p1882_p0, %p1878_p11 }
  0x2e   : > { %1886 = shalt.err (!%p1883_p1)
}
  0x2f   : > { %1805 = dma.hbm_to_vmem [thread:$0]  (!%p2009_p8), %s172_s9, 576, %s174_s8, %s162_s10  }
  0x30   : > { %182 = sbr.rel (%p2033_p5) target bundleno = 338 (0x152), region = 32  ;;  %s184_s22 = sand.u32 (!%p2033_p5), 1, %s1932_s13  }
  0x31   : > { %s1793_s23 = smul.u32 (!%p2033_p5), 576, %s184_s22  ;;  %s185_s24 = scalar_lea.sflag (!%p2033_p5), [#allocation3], %s184_s22 }
  0x33   : > { %s2056_s27 = scalar_lea.vmem (!%p2033_p5), [#allocation2], %s1793_s23 }
  0x35   : > { %1919 = dma.done.wait (%p2000_p7), %s185_s24, 9216  }
  0x36   : > { %1921 = vsyncadd (%p2000_p7), %s185_s24, 4294958080  ;;  %s1794_s28 = smul.u32 36, %s184_s22  ;;  %s195_s29 = scalar_lea.sflag [#allocation5], %s184_s22 }
  0x38   : > { %s2062_s25 = scalar_lea.vmem [#allocation4], %s1794_s28 }
  0x39   : > { %1923 = dma.done.wait (%p2000_p7), %s195_s29, 576  }
  0x3a   : > { %1925 = vsyncadd (%p2000_p7), %s195_s29, 4294966720  ;;  %vm751_vm0 = vcmask 261120   ;;  %v1538_v0 = vld [vmem:[%s2056_s27 + $0x120] sm:$0xf]  ;;  %v1773_v1 = vld [vmem:[%s2056_s27 + $0x1ac] sm:$0xf0] }
  0x3b   : > { %v1755_v2 = vld [vmem:[%s2056_s27 + $0x124] sm:$0xf]  ;;  %v1539_v3 = vor.u32 %v1773_v1, %v1538_v0  ;;  %v1540_v4 = vld [vmem:[%s2056_s27 + $0x1b0] sm:$0xf0]  ;;  %v1546_v5 = vld [vmem:[%s2056_s27 + $0x128] sm:$0xf] }
  0x3c   : > { %v1774_v6 = vld [vmem:[%s2056_s27 + $0x1b4] sm:$0xf0]  ;;  %v1543_v7 = vor.u32 %v1755_v2, %v1540_v4  ;;  %v1756_v9 = vld [vmem:[%s2056_s27 + $0x12c] sm:$0xf]  ;;  %v1548_v10 = vld [vmem:[%s2056_s27 + $0x1b8] sm:$0xf0] }
  0x3d   : > { %v1547_v8 = vor.u32 %v1774_v6, %v1546_v5  ;;  %v1394_v11 = vld [vmem:[%s2056_s27] sm:$0xf]  ;;  %761 = vmatpush.bf16.msra.mxu0 %v1539_v3  ;;  %v1551_v12 = vor.u32 %v1756_v9, %v1548_v10  ;;  %v1737_v13 = vld [vmem:[%s2056_s27 + $0x8c] sm:$0xf0]  ;;  %v1719_v14 = vld [vmem:[%s2056_s27 + $0x4] sm:$0xf] }
  0x3e   : > { %v1396_v15 = vld [vmem:[%s2056_s27 + $0x90] sm:$0xf0]  ;;  %774 = vmatpush.bf16.msra.mxu1 %v1543_v7  ;;  %v1395_v16 = vor.u32 %v1737_v13, %v1394_v11  ;;  %v1402_v18 = vld [vmem:[%s2056_s27 + $0x8] sm:$0xf]  ;;  %v1738_v19 = vld [vmem:[%s2056_s27 + $0x94] sm:$0xf0] }
  0x3f   : > { %787 = vmatpush.bf16.msra.mxu2 %v1547_v8  ;;  %v1399_v17 = vor.u32 %v1719_v14, %v1396_v15  ;;  %v1720_v20 = vld [vmem:[%s2056_s27 + $0xc] sm:$0xf]  ;;  %800 = vmatpush.bf16.msra.mxu3 %v1551_v12  ;;  %v1403_v21 = vor.u32 %v1738_v19, %v1402_v18  ;;  %v1404_v22 = vld [vmem:[%s2056_s27 + $0x98] sm:$0xf0]  ;;  %v2087_v23 = vld [vmem:[%s2350_s0] sm:$0xf] }
  0x40   : > { %v1562_v24 = vld [vmem:[%s2056_s27 + $0x138] sm:$0xf]  ;;  %v1407_v25 = vor.u32 %v1720_v20, %v1404_v22  ;;  %v1776_v26 = vld [vmem:[%s2056_s27 + $0x1c4] sm:$0xf0]  ;;  %v1758_v27 = vld [vmem:[%s2056_s27 + $0x13c] sm:$0xf] }
  0x41   : > { %v1564_v28 = vld [vmem:[%s2056_s27 + $0x1c8] sm:$0xf0]  ;;  %762 = vmatpush.bf16.msra.mxu0 %v1395_v16  ;;  %v1563_v29 = vor.u32 %v1776_v26, %v1562_v24  ;;  %v1554_v31 = vld [vmem:[%s2056_s27 + $0x130] sm:$0xf]  ;;  %v1775_v32 = vld [vmem:[%s2056_s27 + $0x1bc] sm:$0xf0] }
  0x42   : > { %v1567_v30 = vor.u32 %v1758_v27, %v1564_v28  ;;  %v1757_v33 = vld [vmem:[%s2056_s27 + $0x134] sm:$0xf]  ;;  %775 = vmatpush.bf16.msra.mxu1 %v1399_v17  ;;  %v1555_v34 = vor.u32 %v1775_v32, %v1554_v31  ;;  %v1556_v35 = vld [vmem:[%s2056_s27 + $0x1c0] sm:$0xf0]  ;;  %v1418_v36 = vld [vmem:[%s2056_s27 + $0x18] sm:$0xf] }
  0x43   : > { %788 = vmatpush.bf16.msra.mxu2 %v1403_v21  ;;  %v1740_v37 = vld [vmem:[%s2056_s27 + $0xa4] sm:$0xf0]  ;;  %801 = vmatpush.bf16.msra.mxu3 %v1407_v25  ;;  %v1559_v38 = vor.u32 %v1757_v33, %v1556_v35  ;;  %v1722_v40 = vld [vmem:[%s2056_s27 + $0x1c] sm:$0xf]  ;;  %v1420_v41 = vld [vmem:[%s2056_s27 + $0xa8] sm:$0xf0] }
  0x44   : > { %v1419_v39 = vor.u32 %v1740_v37, %v1418_v36  ;;  %v1410_v42 = vld [vmem:[%s2056_s27 + $0x10] sm:$0xf]  ;;  %1680 = vmatmul.msk.bf16.vlgmr.msra.gmra.mxu0 %vm751_vm0, %v2087_v23  ;;  %v1423_v43 = vor.u32 %v1722_v40, %v1420_v41  ;;  %v1739_v44 = vld [vmem:[%s2056_s27 + $0x9c] sm:$0xf0]  ;;  %v1721_v45 = vld [vmem:[%s2056_s27 + $0x14] sm:$0xf] }
  0x45   : > { %v1412_v46 = vld [vmem:[%s2056_s27 + $0xa0] sm:$0xf0]  ;;  %1681 = vmatmul.msk.bf16.vlgmr.msra.gmra.mxu1 %vm751_vm0, %v2087_v23  ;;  %v1578_v47 = vld [vmem:[%s2056_s27 + $0x148] sm:$0xf]  ;;  %v1778_v48 = vld [vmem:[%s2056_s27 + $0x1d4] sm:$0xf0]  ;;  %813 = vmatpush.bf16.msrb.mxu0 %v1555_v34  ;;  %v1411_v50 = vor.u32 %v1739_v44, %v1410_v42 }
  0x46   : > { %1682 = vmatmul.msk.bf16.vlgmr.msra.gmra.mxu2 %vm751_vm0, %v2087_v23  ;;  %v1760_v49 = vld [vmem:[%s2056_s27 + $0x14c] sm:$0xf]  ;;  %1683 = vmatmul.msk.bf16.vlgmr.msra.gmra.mxu3 %vm751_vm0, %v2087_v23  ;;  %v1579_v51 = vor.u32 %v1778_v48, %v1578_v47  ;;  %v1580_v52 = vld [vmem:[%s2056_s27 + $0x1d8] sm:$0xf0]  ;;  %v1570_v53 = vld [vmem:[%s2056_s27 + $0x140] sm:$0xf]  ;;  %v1415_v55 = vor.u32 %v1721_v45, %v1412_v46 }
  0x47   : > { %839 = vmatpush.bf16.msrb.mxu2 %v1563_v29  ;;  %852 = vmatpush.bf16.msrb.mxu3 %v1567_v30  ;;  %v1777_v54 = vld [vmem:[%s2056_s27 + $0x1cc] sm:$0xf0]  ;;  %v1583_v56 = vor.u32 %v1760_v49, %v1580_v52  ;;  %v1759_v58 = vld [vmem:[%s2056_s27 + $0x144] sm:$0xf]  ;;  %v1572_v59 = vld [vmem:[%s2056_s27 + $0x1d0] sm:$0xf0] }
  0x48   : > { %826 = vmatpush.bf16.msrb.mxu1 %v1559_v38  ;;  %v1571_v57 = vor.u32 %v1777_v54, %v1570_v53  ;;  %v1434_v60 = vld [vmem:[%s2056_s27 + $0x28] sm:$0xf]  ;;  %v1575_v61 = vor.u32 %v1759_v58, %v1572_v59  ;;  %v1742_v62 = vld [vmem:[%s2056_s27 + $0xb4] sm:$0xf0]  ;;  %v1724_v63 = vld [vmem:[%s2056_s27 + $0x2c] sm:$0xf] }
  0x49   : > { %v1436_v0 = vld [vmem:[%s2056_s27 + $0xb8] sm:$0xf0]  ;;  %v1435_v1 = vor.u32 %v1742_v62, %v1434_v60  ;;  %v1426_v3 = vld [vmem:[%s2056_s27 + $0x20] sm:$0xf]  ;;  %v1741_v4 = vld [vmem:[%s2056_s27 + $0xac] sm:$0xf0]  ;;  %814 = vmatpush.bf16.msrb.mxu0 %v1411_v50 }
  0x4a   : > { %v1439_v2 = vor.u32 %v1724_v63, %v1436_v0  ;;  %v1723_v5 = vld [vmem:[%s2056_s27 + $0x24] sm:$0xf]  ;;  %v1428_v6 = vld [vmem:[%s2056_s27 + $0xb0] sm:$0xf0]  ;;  %v1427_v7 = vor.u32 %v1741_v4, %v1426_v3  ;;  %v1594_v9 = vld [vmem:[%s2056_s27 + $0x158] sm:$0xf] }
  0x4b   : > { %840 = vmatpush.bf16.msrb.mxu2 %v1419_v39  ;;  %853 = vmatpush.bf16.msrb.mxu3 %v1423_v43  ;;  %v1431_v8 = vor.u32 %v1723_v5, %v1428_v6  ;;  %v1780_v10 = vld [vmem:[%s2056_s27 + $0x1e4] sm:$0xf0]  ;;  %v1762_v11 = vld [vmem:[%s2056_s27 + $0x15c] sm:$0xf]  ;;  %v1596_v12 = vld [vmem:[%s2056_s27 + $0x1e8] sm:$0xf0] }
  0x4c   : > { %827 = vmatpush.bf16.msrb.mxu1 %v1415_v55  ;;  %v1586_v13 = vld [vmem:[%s2056_s27 + $0x150] sm:$0xf]  ;;  %v1779_v14 = vld [vmem:[%s2056_s27 + $0x1dc] sm:$0xf0]  ;;  %v1761_v15 = vld [vmem:[%s2056_s27 + $0x154] sm:$0xf]  ;;  %v1595_v17 = vor.u32 %v1780_v10, %v1594_v9  ;;  %v1599_v18 = vor.u32 %v1762_v11, %v1596_v12 }
  0x4d   : > { %865 = vmatpush.bf16.msra.mxu0 %v1571_v57  ;;  %v1588_v16 = vld [vmem:[%s2056_s27 + $0x1e0] sm:$0xf0]  ;;  %v1587_v19 = vor.u32 %v1779_v14, %v1586_v13  ;;  %v1450_v20 = vld [vmem:[%s2056_s27 + $0x38] sm:$0xf]  ;;  %v1744_v21 = vld [vmem:[%s2056_s27 + $0xc4] sm:$0xf0] }
  0x4e   : > { %v1726_v22 = vld [vmem:[%s2056_s27 + $0x3c] sm:$0xf]  ;;  %v1591_v24 = vor.u32 %v1761_v15, %v1588_v16  ;;  %v1452_v25 = vld [vmem:[%s2056_s27 + $0xc8] sm:$0xf0]  ;;  %v1442_v26 = vld [vmem:[%s2056_s27 + $0x30] sm:$0xf]  ;;  %v1451_v30 = vor.u32 %v1744_v21, %v1450_v20 }
  0x4f   : > { %891 = vmatpush.bf16.msra.mxu2 %v1579_v51  ;;  %904 = vmatpush.bf16.msra.mxu3 %v1583_v56  ;;  %v1743_v27 = vld [vmem:[%s2056_s27 + $0xbc] sm:$0xf0]  ;;  %v1725_v28 = vld [vmem:[%s2056_s27 + $0x34] sm:$0xf]  ;;  %v1444_v29 = vld [vmem:[%s2056_s27 + $0xc0] sm:$0xf0]  ;;  %v1455_v31 = vor.u32 %v1726_v22, %v1452_v25 }
  0x50   : > { %878 = vmatpush.bf16.msra.mxu1 %v1575_v61  ;;  %v1443_v32 = vor.u32 %v1743_v27, %v1442_v26  ;;  %v1447_v33 = vor.u32 %v1725_v28, %v1444_v29  ;;  %v1610_v34 = vld [vmem:[%s2056_s27 + $0x168] sm:$0xf]  ;;  %v1782_v35 = vld [vmem:[%s2056_s27 + $0x1f4] sm:$0xf0]  ;;  %v1764_v36 = vld [vmem:[%s2056_s27 + $0x16c] sm:$0xf] }
  0x51   : > { %866 = vmatpush.bf16.msra.mxu0 %v1427_v7  ;;  %v1612_v37 = vld [vmem:[%s2056_s27 + $0x1f8] sm:$0xf0]  ;;  %v1602_v38 = vld [vmem:[%s2056_s27 + $0x160] sm:$0xf]  ;;  %v1781_v39 = vld [vmem:[%s2056_s27 + $0x1ec] sm:$0xf0]  ;;  %v1611_v42 = vor.u32 %v1782_v35, %v1610_v34 }
  0x52   : > { %v1763_v40 = vld [vmem:[%s2056_s27 + $0x164] sm:$0xf]  ;;  %v1604_v41 = vld [vmem:[%s2056_s27 + $0x1f0] sm:$0xf0]  ;;  %v1615_v43 = vor.u32 %v1764_v36, %v1612_v37  ;;  %v1603_v44 = vor.u32 %v1781_v39, %v1602_v38  ;;  %v1466_v45 = vld [vmem:[%s2056_s27 + $0x48] sm:$0xf] }
  0x53   : > { %892 = vmatpush.bf16.msra.mxu2 %v1435_v1  ;;  %905 = vmatpush.bf16.msra.mxu3 %v1439_v2  ;;  %v1746_v46 = vld [vmem:[%s2056_s27 + $0xd4] sm:$0xf0]  ;;  %v1728_v47 = vld [vmem:[%s2056_s27 + $0x4c] sm:$0xf]  ;;  %v1607_v48 = vor.u32 %v1763_v40, %v1604_v41  ;;  %v1468_v49 = vld [vmem:[%s2056_s27 + $0xd8] sm:$0xf0] }
  0x54   : > { %879 = vmatpush.bf16.msra.mxu1 %v1431_v8  ;;  %1684 = vmatmul.msk.bf16.vlgmr.msrb.gmra.mxu0 %vm751_vm0, %v2087_v23  ;;  %v1458_v50 = vld [vmem:[%s2056_s27 + $0x40] sm:$0xf]  ;;  %v1745_v51 = vld [vmem:[%s2056_s27 + $0xcc] sm:$0xf0]  ;;  %v1727_v52 = vld [vmem:[%s2056_s27 + $0x44] sm:$0xf]  ;;  %v1467_v54 = vor.u32 %v1746_v46, %v1466_v45  ;;  %v1471_v55 = vor.u32 %v1728_v47, %v1468_v49 }
  0x55   : > { %1685 = vmatmul.msk.bf16.vlgmr.msrb.gmra.mxu1 %vm751_vm0, %v2087_v23  ;;  %917 = vmatpush.bf16.msrb.mxu0 %v1587_v19  ;;  %v1460_v53 = vld [vmem:[%s2056_s27 + $0xd0] sm:$0xf0]  ;;  %v1459_v56 = vor.u32 %v1745_v51, %v1458_v50  ;;  %v1626_v58 = vld [vmem:[%s2056_s27 + $0x178] sm:$0xf]  ;;  %v1784_v59 = vld [vmem:[%s2056_s27 + $0x204] sm:$0xf0] }
  0x56   : > { %1686 = vmatmul.msk.bf16.vlgmr.msrb.gmra.mxu2 %vm751_vm0, %v2087_v23  ;;  %1687 = vmatmul.msk.bf16.vlgmr.msrb.gmra.mxu3 %vm751_vm0, %v2087_v23  ;;  %v1463_v57 = vor.u32 %v1727_v52, %v1460_v53  ;;  %v1766_v60 = vld [vmem:[%s2056_s27 + $0x17c] sm:$0xf]  ;;  %v1628_v61 = vld [vmem:[%s2056_s27 + $0x208] sm:$0xf0]  ;;  %v1618_v62 = vld [vmem:[%s2056_s27 + $0x170] sm:$0xf]  ;;  %v1627_v2 = vor.u32 %v1784_v59, %v1626_v58 }
  0x57   : > { %943 = vmatpush.bf16.msrb.mxu2 %v1595_v17  ;;  %956 = vmatpush.bf16.msrb.mxu3 %v1599_v18  ;;  %v1783_v63 = vld [vmem:[%s2056_s27 + $0x1fc] sm:$0xf0]  ;;  %v1765_v0 = vld [vmem:[%s2056_s27 + $0x174] sm:$0xf]  ;;  %v1620_v1 = vld [vmem:[%s2056_s27 + $0x200] sm:$0xf0]  ;;  %v1631_v3 = vor.u32 %v1766_v60, %v1628_v61 }
  0x58   : > { %930 = vmatpush.bf16.msrb.mxu1 %v1591_v24  ;;  %v1619_v4 = vor.u32 %v1783_v63, %v1618_v62  ;;  %v1482_v5 = vld [vmem:[%s2056_s27 + $0x58] sm:$0xf]  ;;  %v1748_v6 = vld [vmem:[%s2056_s27 + $0xe4] sm:$0xf0]  ;;  %v1730_v7 = vld [vmem:[%s2056_s27 + $0x5c] sm:$0xf]  ;;  %v1623_v8 = vor.u32 %v1765_v0, %v1620_v1 }
  0x59   : > { %918 = vmatpush.bf16.msrb.mxu0 %v1443_v32  ;;  %v1484_v9 = vld [vmem:[%s2056_s27 + $0xe8] sm:$0xf0]  ;;  %v1474_v10 = vld [vmem:[%s2056_s27 + $0x50] sm:$0xf]  ;;  %v1747_v11 = vld [vmem:[%s2056_s27 + $0xdc] sm:$0xf0]  ;;  %v1483_v14 = vor.u32 %v1748_v6, %v1482_v5 }
  0x5a   : > { %v1729_v12 = vld [vmem:[%s2056_s27 + $0x54] sm:$0xf]  ;;  %v1476_v13 = vld [vmem:[%s2056_s27 + $0xe0] sm:$0xf0]  ;;  %v1487_v15 = vor.u32 %v1730_v7, %v1484_v9  ;;  %v1475_v16 = vor.u32 %v1747_v11, %v1474_v10  ;;  %v1642_v18 = vld [vmem:[%s2056_s27 + $0x188] sm:$0xf] }
  0x5b   : > { %944 = vmatpush.bf16.msrb.mxu2 %v1451_v30  ;;  %957 = vmatpush.bf16.msrb.mxu3 %v1455_v31  ;;  %v1479_v17 = vor.u32 %v1729_v12, %v1476_v13  ;;  %v1786_v19 = vld [vmem:[%s2056_s27 + $0x214] sm:$0xf0]  ;;  %v1768_v20 = vld [vmem:[%s2056_s27 + $0x18c] sm:$0xf]  ;;  %v1644_v21 = vld [vmem:[%s2056_s27 + $0x218] sm:$0xf0] }
  0x5c   : > { %931 = vmatpush.bf16.msrb.mxu1 %v1447_v33  ;;  %v1634_v22 = vld [vmem:[%s2056_s27 + $0x180] sm:$0xf]  ;;  %v1785_v24 = vld [vmem:[%s2056_s27 + $0x20c] sm:$0xf0]  ;;  %v1767_v25 = vld [vmem:[%s2056_s27 + $0x184] sm:$0xf]  ;;  %v1643_v27 = vor.u32 %v1786_v19, %v1642_v18  ;;  %v1647_v28 = vor.u32 %v1768_v20, %v1644_v21 }
  0x5d   : > { %v1636_v26 = vld [vmem:[%s2056_s27 + $0x210] sm:$0xf0]  ;;  %v1635_v29 = vor.u32 %v1785_v24, %v1634_v22  ;;  %v1498_v30 = vld [vmem:[%s2056_s27 + $0x68] sm:$0xf]  ;;  %v1750_v31 = vld [vmem:[%s2056_s27 + $0xf4] sm:$0xf0] }
  0x5e   : > { %v1732_v32 = vld [vmem:[%s2056_s27 + $0x6c] sm:$0xf]  ;;  %v1639_v33 = vor.u32 %v1767_v25, %v1636_v26  ;;  %v1500_v34 = vld [vmem:[%s2056_s27 + $0xf8] sm:$0xf0]  ;;  %v1490_v35 = vld [vmem:[%s2056_s27 + $0x60] sm:$0xf]  ;;  %v1499_v39 = vor.u32 %v1750_v31, %v1498_v30 }
  0x5f   : > { %v1749_v36 = vld [vmem:[%s2056_s27 + $0xec] sm:$0xf0]  ;;  %v1731_v37 = vld [vmem:[%s2056_s27 + $0x64] sm:$0xf]  ;;  %v1492_v38 = vld [vmem:[%s2056_s27 + $0xf0] sm:$0xf0]  ;;  %v1503_v40 = vor.u32 %v1732_v32, %v1500_v34 }
  0x60   : > { %v1491_v41 = vor.u32 %v1749_v36, %v1490_v35  ;;  %v1770_v45 = vld [vmem:[%s2056_s27 + $0x19c] sm:$0xf]  ;;  %v1660_v46 = vld [vmem:[%s2056_s27 + $0x228] sm:$0xf0]  ;;  %v1650_v47 = vld [vmem:[%s2056_s27 + $0x190] sm:$0xf] }
  0x61   : > { %v1769_v49 = vld [vmem:[%s2056_s27 + $0x194] sm:$0xf]  ;;  %v1652_v50 = vld [vmem:[%s2056_s27 + $0x220] sm:$0xf0]  ;;  %v1663_v52 = vor.u32 %v1770_v45, %v1660_v46  ;;  %v1516_v58 = vld [vmem:[%s2056_s27 + $0x108] sm:$0xf0] }
  0x62   : > { %v1506_v59 = vld [vmem:[%s2056_s27 + $0x70] sm:$0xf]  ;;  %v1751_v60 = vld [vmem:[%s2056_s27 + $0xfc] sm:$0xf0]  ;;  %v1733_v61 = vld [vmem:[%s2056_s27 + $0x74] sm:$0xf] }
  0x63   : > { %v1508_v62 = vld [vmem:[%s2056_s27 + $0x100] sm:$0xf0]  ;;  %v1507_v1 = vor.u32 %v1751_v60, %v1506_v59  ;;  %v1772_v5 = vld [vmem:[%s2056_s27 + $0x1ac] sm:$0xf]  ;;  %v1676_v6 = vld [vmem:[%s2056_s27 + $0x238] sm:$0xf0] }
  0x64   : > { %1688 = vmatmul.msk.bf16.vlgmr.msra.gmra.mxu0 %vm751_vm0, %v2087_v23  ;;  %v1666_v7 = vld [vmem:[%s2056_s27 + $0x1a0] sm:$0xf]  ;;  %v1771_v9 = vld [vmem:[%s2056_s27 + $0x1a4] sm:$0xf]  ;;  %v1668_v10 = vld [vmem:[%s2056_s27 + $0x230] sm:$0xf0]  ;;  %v1679_v12 = vor.u32 %v1772_v5, %v1676_v6 }
  0x65   : > { %1689 = vmatmul.msk.bf16.vlgmr.msra.gmra.mxu1 %vm751_vm0, %v2087_v23  ;;  %969 = vmatpush.bf16.msra.mxu0 %v1603_v44  ;;  %v1788_v44 = vld [vmem:[%s2056_s27 + $0x224] sm:$0xf0]  ;;  %v1532_v18 = vld [vmem:[%s2056_s27 + $0x118] sm:$0xf0]  ;;  %v1522_v19 = vld [vmem:[%s2056_s27 + $0x80] sm:$0xf] }
  0x66   : > { %1690 = vmatmul.msk.bf16.vlgmr.msra.gmra.mxu2 %vm751_vm0, %v2087_v23  ;;  %1691 = vmatmul.msk.bf16.vlgmr.msra.gmra.mxu3 %vm751_vm0, %v2087_v23  ;;  %v1753_v20 = vld [vmem:[%s2056_s27 + $0x10c] sm:$0xf0]  ;;  %v1735_v21 = vld [vmem:[%s2056_s27 + $0x84] sm:$0xf]  ;;  %v1524_v22 = vld [vmem:[%s2056_s27 + $0x110] sm:$0xf0] }
  0x67   : > { %995 = vmatpush.bf16.msra.mxu2 %v1611_v42  ;;  %1008 = vmatpush.bf16.msra.mxu3 %v1615_v43  ;;  %v1495_v42 = vor.u32 %v1731_v37, %v1492_v38  ;;  %v1658_v43 = vld [vmem:[%s2056_s27 + $0x198] sm:$0xf]  ;;  %v1523_v26 = vor.u32 %v1753_v20, %v1522_v19  ;;  %s229_s6 = smul.u32 36, %s1385_s16 }
  0x68   : > { %982 = vmatpush.bf16.msra.mxu1 %v1607_v48  ;;  %v1787_v48 = vld [vmem:[%s2056_s27 + $0x21c] sm:$0xf0]  ;;  %v1659_v51 = vor.u32 %v1788_v44, %v1658_v43 }
  0x69   : > { %970 = vmatpush.bf16.msra.mxu0 %v1459_v56  ;;  %v1651_v53 = vor.u32 %v1787_v48, %v1650_v47  ;;  %v1734_v56 = vld [vmem:[%s2056_s27 + $0x7c] sm:$0xf]  ;;  %p230_p7 = scmp.lt.s32.totalorder %s229_s6, 71 }
  0x6a   : > { %v1519_v0 = vor.u32 %v1734_v56, %v1516_v58 }
  0x6b   : > { %996 = vmatpush.bf16.msra.mxu2 %v1467_v54  ;;  %1009 = vmatpush.bf16.msra.mxu3 %v1471_v55  ;;  %v1514_v54 = vld [vmem:[%s2056_s27 + $0x78] sm:$0xf]  ;;  %v1752_v55 = vld [vmem:[%s2056_s27 + $0x104] sm:$0xf0]  ;;  %s2362_s6 = smov (!%p230_p7, %s229_s6), 71 }
  0x6c   : > { %983 = vmatpush.bf16.msra.mxu1 %v1463_v57  ;;  %v1655_v57 = vor.u32 %v1769_v49, %v1652_v50  ;;  %v1515_v63 = vor.u32 %v1752_v55, %v1514_v54  ;;  %s1391_s7 = sshll.u32 %s2362_s6, 3 }
  0x6d   : > { %s2287_s8 = scalar_lea.vmem %s2353_s3, %s1391_s7 }
  0x74   : > { %1692 = vmatmul.msk.bf16.vlgmr.msrb.gmra.mxu0 %vm751_vm0, %v2087_v23 }
  0x75   : > { %1693 = vmatmul.msk.bf16.vlgmr.msrb.gmra.mxu1 %vm751_vm0, %v2087_v23  ;;  %1021 = vmatpush.bf16.msrb.mxu0 %v1619_v4  ;;  %v1790_v4 = vld [vmem:[%s2056_s27 + $0x234] sm:$0xf0] }
  0x76   : > { %1694 = vmatmul.msk.bf16.vlgmr.msrb.gmra.mxu2 %vm751_vm0, %v2087_v23  ;;  %1695 = vmatmul.msk.bf16.vlgmr.msrb.gmra.mxu3 %vm751_vm0, %v2087_v23 }
  0x77   : > { %1047 = vmatpush.bf16.msrb.mxu2 %v1627_v2  ;;  %1060 = vmatpush.bf16.msrb.mxu3 %v1631_v3  ;;  %v1511_v2 = vor.u32 %v1733_v61, %v1508_v62  ;;  %v1674_v3 = vld [vmem:[%s2056_s27 + $0x1a8] sm:$0xf] }
  0x78   : > { %1034 = vmatpush.bf16.msrb.mxu1 %v1623_v8  ;;  %v1789_v8 = vld [vmem:[%s2056_s27 + $0x22c] sm:$0xf0]  ;;  %v1675_v11 = vor.u32 %v1790_v4, %v1674_v3 }
  0x79   : > { %1022 = vmatpush.bf16.msrb.mxu0 %v1475_v16  ;;  %v1667_v13 = vor.u32 %v1789_v8, %v1666_v7  ;;  %v1736_v16 = vld [vmem:[%s2056_s27 + $0x8c] sm:$0xf] }
  0x7a   : > { %v1535_v25 = vor.u32 %v1736_v16, %v1532_v18 }
  0x7b   : > { %1048 = vmatpush.bf16.msrb.mxu2 %v1483_v14  ;;  %1061 = vmatpush.bf16.msrb.mxu3 %v1487_v15  ;;  %v1530_v14 = vld [vmem:[%s2056_s27 + $0x88] sm:$0xf]  ;;  %v1754_v15 = vld [vmem:[%s2056_s27 + $0x114] sm:$0xf0] }
  0x7c   : > { %1035 = vmatpush.bf16.msrb.mxu1 %v1479_v17  ;;  %v1671_v17 = vor.u32 %v1771_v9, %v1668_v10  ;;  %v1531_v24 = vor.u32 %v1754_v15, %v1530_v14 }
  0x84   : > { %1696 = vmatmul.msk.bf16.vlgmr.msra.gmra.mxu0 %vm751_vm0, %v2087_v23 }
  0x85   : > { %1697 = vmatmul.msk.bf16.vlgmr.msra.gmra.mxu1 %vm751_vm0, %v2087_v23  ;;  %1073 = vmatpush.bf16.msra.mxu0 %v1635_v29 }
  0x86   : > { %1698 = vmatmul.msk.bf16.vlgmr.msra.gmra.mxu2 %vm751_vm0, %v2087_v23  ;;  %1699 = vmatmul.msk.bf16.vlgmr.msra.gmra.mxu3 %vm751_vm0, %v2087_v23 }
  0x87   : > { %1099 = vmatpush.bf16.msra.mxu2 %v1643_v27  ;;  %1112 = vmatpush.bf16.msra.mxu3 %v1647_v28  ;;  %v1527_v27 = vor.u32 %v1735_v21, %v1524_v22  ;;  %v309_v28 = vld [vmem:[%s2062_s25] sm:$0xff] }
  0x88   : > { %1086 = vmatpush.bf16.msra.mxu1 %v1639_v33  ;;  %v319_v29 = vperm.slane %v309_v28, 0  ;;  %v320_v30 = vperm.slane %v309_v28, 1  ;;  %v321_v37 = vperm.slane %v309_v28, 2  ;;  %v322_v38 = vperm.slane %v309_v28, 3 }
  0x89   : > { %1074 = vmatpush.bf16.msra.mxu0 %v1491_v41  ;;  %v323_v47 = vperm.slane %v309_v28, 4  ;;  %v324_v48 = vperm.slane %v309_v28, 5  ;;  %v325_v56 = vperm.slane %v309_v28, 6 }
  0x8b   : > { %1100 = vmatpush.bf16.msra.mxu2 %v1499_v39  ;;  %1113 = vmatpush.bf16.msra.mxu3 %v1503_v40 }
  0x8c   : > { %1087 = vmatpush.bf16.msra.mxu1 %v1495_v42 }
  0x94   : > { %1700 = vmatmul.msk.bf16.vlgmr.msrb.gmra.mxu0 %vm751_vm0, %v2087_v23 }
  0x95   : > { %1701 = vmatmul.msk.bf16.vlgmr.msrb.gmra.mxu1 %vm751_vm0, %v2087_v23  ;;  %1125 = vmatpush.bf16.msrb.mxu0 %v1651_v53 }
  0x96   : > { %1702 = vmatmul.msk.bf16.vlgmr.msrb.gmra.mxu2 %vm751_vm0, %v2087_v23  ;;  %1703 = vmatmul.msk.bf16.vlgmr.msrb.gmra.mxu3 %vm751_vm0, %v2087_v23 }
  0x97   : > { %1151 = vmatpush.bf16.msrb.mxu2 %v1659_v51  ;;  %1164 = vmatpush.bf16.msrb.mxu3 %v1663_v52 }
  0x98   : > { %1138 = vmatpush.bf16.msrb.mxu1 %v1655_v57  ;;  %v326_v57 = vperm.slane %v309_v28, 7 }
  0x99   : > { %1126 = vmatpush.bf16.msrb.mxu0 %v1507_v1  ;;  %v310_v1 = vld [vmem:[%s2062_s25 + $0x8] sm:$0xff] }
  0x9a   : > { %v327_v3 = vperm.slane %v310_v1, 0  ;;  %v328_v4 = vperm.slane %v310_v1, 1  ;;  %v330_v14 = vperm.slane %v310_v1, 3 }
  0x9b   : > { %1152 = vmatpush.bf16.msrb.mxu2 %v1515_v63  ;;  %1165 = vmatpush.bf16.msrb.mxu3 %v1519_v0 }
  0x9c   : > { %1139 = vmatpush.bf16.msrb.mxu1 %v1511_v2 }
  0xa4   : > { %1704 = vmatmul.msk.bf16.vlgmr.msra.gmra.mxu0 %vm751_vm0, %v2087_v23 }
  0xa5   : > { %1705 = vmatmul.msk.bf16.vlgmr.msra.gmra.mxu1 %vm751_vm0, %v2087_v23  ;;  %1177 = vmatpush.bf16.msra.mxu0 %v1667_v13  ;;  %v329_v13 = vperm.slane %v310_v1, 2 }
  0xa6   : > { %1706 = vmatmul.msk.bf16.vlgmr.msra.gmra.mxu2 %vm751_vm0, %v2087_v23  ;;  %1707 = vmatmul.msk.bf16.vlgmr.msra.gmra.mxu3 %vm751_vm0, %v2087_v23 }
  0xa7   : > { %1203 = vmatpush.bf16.msra.mxu2 %v1675_v11  ;;  %1216 = vmatpush.bf16.msra.mxu3 %v1679_v12 }
  0xa8   : > { %1190 = vmatpush.bf16.msra.mxu1 %v1671_v17 }
  0xa9   : > { %1178 = vmatpush.bf16.msra.mxu0 %v1523_v26 }
  0xab   : > { %1204 = vmatpush.bf16.msra.mxu2 %v1531_v24  ;;  %1217 = vmatpush.bf16.msra.mxu3 %v1535_v25  ;;  %v331_v24 = vperm.slane %v310_v1, 4  ;;  %v332_v25 = vperm.slane %v310_v1, 5 }
  0xac   : > { %1191 = vmatpush.bf16.msra.mxu1 %v1527_v27 }
  0xb4   : > { %1708 = vmatmul.msk.bf16.vlgmr.msrb.gmra.mxu0 %vm751_vm0, %v2087_v23 }
  0xb5   : > { %1709 = vmatmul.msk.bf16.vlgmr.msrb.gmra.mxu1 %vm751_vm0, %v2087_v23 }
  0xb6   : > { %1710 = vmatmul.msk.bf16.vlgmr.msrb.gmra.mxu2 %vm751_vm0, %v2087_v23  ;;  %1711 = vmatmul.msk.bf16.vlgmr.msrb.gmra.mxu3 %vm751_vm0, %v2087_v23 }
  0xc1   : > { %v764_v31 = vpop.f32.mrf.mxu0 }
  0xc2   : > { %v765_v32 = vadd.f32 %v764_v31, %v319_v29  ;;  %v777_v33 = vpop.f32.mrf.mxu1 }
  0xc3   : > { %v778_v34 = vadd.f32 %v777_v33, %v320_v30 }
  0xc4   : > { %v1223_v35 = vmax.f32 %v765_v32, 0.0  ;;  %1712 = vmatmul.msk.bf16.vlgmr.msra.gmra.mxu0 %vm751_vm0, %v2087_v23 }
  0xc5   : > { %v1224_v36 = vmax.f32 %v778_v34, 0.0  ;;  %1713 = vmatmul.msk.bf16.vlgmr.msra.gmra.mxu1 %vm751_vm0, %v2087_v23  ;;  %v333_v34 = vperm.slane %v310_v1, 6 }
  0xc6   : > { %1714 = vmatmul.msk.bf16.vlgmr.msra.gmra.mxu2 %vm751_vm0, %v2087_v23  ;;  %1259 = vst [vmem:[%s2287_s8] sm:$0xff] %v1223_v35  ;;  %1715 = vmatmul.msk.bf16.vlgmr.msra.gmra.mxu3 %vm751_vm0, %v2087_v23  ;;  %v334_v35 = vperm.slane %v310_v1, 7 }
  0xc7   : > { %1260 = vst [vmem:[%s2287_s8 + $0x8] sm:$0xff] %v1224_v36 }
  0xc9   : > { %v790_v39 = vpop.f32.mrf.mxu2  ;;  %v803_v41 = vpop.f32.mrf.mxu3 }
  0xca   : > { %v791_v40 = vadd.f32 %v790_v39, %v321_v37  ;;  %v766_v42 = vpop.f32.mrf.mxu0  ;;  %v804_v43 = vadd.f32 %v803_v41, %v322_v38  ;;  %v779_v44 = vpop.f32.mrf.mxu1 }
  0xcc   : > { %v1225_v45 = vmax.f32 %v791_v40, 0.0  ;;  %v1226_v46 = vmax.f32 %v804_v43, 0.0  ;;  %v311_v43 = vld [vmem:[%s2062_s25 + $0x10] sm:$0xff] }
  0xcd   : > { %v340_v1 = vperm.slane %v311_v43, 5 }
  0xce   : > { %1261 = vst [vmem:[%s2287_s8 + $0x10] sm:$0xff] %v1225_v45  ;;  %v335_v45 = vperm.slane %v311_v43, 0 }
  0xcf   : > { %1262 = vst [vmem:[%s2287_s8 + $0x18] sm:$0xff] %v1226_v46  ;;  %v336_v46 = vperm.slane %v311_v43, 1 }
  0xd1   : > { %v792_v49 = vpop.f32.mrf.mxu2  ;;  %v805_v50 = vpop.f32.mrf.mxu3 }
  0xd2   : > { %v816_v51 = vpop.f32.mrf.mxu0  ;;  %v829_v52 = vpop.f32.mrf.mxu1 }
  0xd3   : > { %v817_v23 = vadd.f32 %v816_v51, %v323_v47  ;;  %v830_v53 = vadd.f32 %v829_v52, %v324_v48 }
  0xd5   : > { %v1227_v54 = vmax.f32 %v817_v23, 0.0  ;;  %v1228_v55 = vmax.f32 %v830_v53, 0.0 }
  0xd7   : > { %1263 = vst [vmem:[%s2287_s8 + $0x20] sm:$0xff] %v1227_v54  ;;  %v337_v54 = vperm.slane %v311_v43, 2 }
  0xd8   : > { %1264 = vst [vmem:[%s2287_s8 + $0x28] sm:$0xff] %v1228_v55  ;;  %v338_v55 = vperm.slane %v311_v43, 3 }
  0xd9   : > { %v842_v58 = vpop.f32.mrf.mxu2  ;;  %v855_v60 = vpop.f32.mrf.mxu3 }
  0xda   : > { %v843_v59 = vadd.f32 %v842_v58, %v325_v56  ;;  %v818_v61 = vpop.f32.mrf.mxu0  ;;  %v856_v62 = vadd.f32 %v855_v60, %v326_v57  ;;  %v831_v63 = vpop.f32.mrf.mxu1 }
  0xdc   : > { %v1229_v0 = vmax.f32 %v843_v59, 0.0  ;;  %v1230_v2 = vmax.f32 %v856_v62, 0.0 }
  0xde   : > { %1265 = vst [vmem:[%s2287_s8 + $0x30] sm:$0xff] %v1229_v0  ;;  %v339_v0 = vperm.slane %v311_v43, 4 }
  0xdf   : > { %1266 = vst [vmem:[%s2287_s8 + $0x38] sm:$0xff] %v1230_v2 }
  0xe1   : > { %v844_v5 = vpop.f32.mrf.mxu2  ;;  %v857_v6 = vpop.f32.mrf.mxu3 }
  0xe2   : > { %v868_v7 = vpop.f32.mrf.mxu0  ;;  %v881_v9 = vpop.f32.mrf.mxu1 }
  0xe3   : > { %v869_v8 = vadd.f32 %v868_v7, %v327_v3  ;;  %v882_v10 = vadd.f32 %v881_v9, %v328_v4 }
  0xe5   : > { %v1231_v11 = vmax.f32 %v869_v8, 0.0  ;;  %v1232_v12 = vmax.f32 %v882_v10, 0.0  ;;  %v341_v10 = vperm.slane %v311_v43, 6 }
  0xe7   : > { %1267 = vst [vmem:[%s2287_s8 + $0x40] sm:$0xff] %v1231_v11  ;;  %v342_v11 = vperm.slane %v311_v43, 7 }
  0xe8   : > { %1268 = vst [vmem:[%s2287_s8 + $0x48] sm:$0xff] %v1232_v12 }
  0xe9   : > { %v894_v15 = vpop.f32.mrf.mxu2  ;;  %v907_v17 = vpop.f32.mrf.mxu3 }
  0xea   : > { %v895_v16 = vadd.f32 %v894_v15, %v329_v13  ;;  %v870_v18 = vpop.f32.mrf.mxu0  ;;  %v908_v19 = vadd.f32 %v907_v17, %v330_v14  ;;  %v883_v20 = vpop.f32.mrf.mxu1 }
  0xec   : > { %v1233_v21 = vmax.f32 %v895_v16, 0.0  ;;  %v1234_v22 = vmax.f32 %v908_v19, 0.0  ;;  %v312_v19 = vld [vmem:[%s2062_s25 + $0x18] sm:$0xff] }
  0xed   : > { %v348_v43 = vperm.slane %v312_v19, 5 }
  0xee   : > { %1269 = vst [vmem:[%s2287_s8 + $0x50] sm:$0xff] %v1233_v21  ;;  %v343_v21 = vperm.slane %v312_v19, 0 }
  0xef   : > { %1270 = vst [vmem:[%s2287_s8 + $0x58] sm:$0xff] %v1234_v22  ;;  %v344_v22 = vperm.slane %v312_v19, 1 }
  0xf1   : > { %v896_v26 = vpop.f32.mrf.mxu2  ;;  %v909_v27 = vpop.f32.mrf.mxu3 }
  0xf2   : > { %v920_v28 = vpop.f32.mrf.mxu0  ;;  %v933_v30 = vpop.f32.mrf.mxu1 }
  0xf3   : > { %v921_v29 = vadd.f32 %v920_v28, %v331_v24  ;;  %v934_v31 = vadd.f32 %v933_v30, %v332_v25 }
  0xf5   : > { %v1235_v32 = vmax.f32 %v921_v29, 0.0  ;;  %v1236_v33 = vmax.f32 %v934_v31, 0.0 }
  0xf7   : > { %1271 = vst [vmem:[%s2287_s8 + $0x60] sm:$0xff] %v1235_v32  ;;  %v345_v32 = vperm.slane %v312_v19, 2 }
  0xf8   : > { %1272 = vst [vmem:[%s2287_s8 + $0x68] sm:$0xff] %v1236_v33  ;;  %v346_v33 = vperm.slane %v312_v19, 3 }
  0xf9   : > { %v946_v36 = vpop.f32.mrf.mxu2  ;;  %v959_v38 = vpop.f32.mrf.mxu3 }
  0xfa   : > { %v947_v37 = vadd.f32 %v946_v36, %v333_v34  ;;  %v922_v39 = vpop.f32.mrf.mxu0  ;;  %v960_v40 = vadd.f32 %v959_v38, %v334_v35  ;;  %v935_v41 = vpop.f32.mrf.mxu1 }
  0xfc   : > { %v1237_v42 = vmax.f32 %v947_v37, 0.0  ;;  %v1238_v44 = vmax.f32 %v960_v40, 0.0 }
  0xfe   : > { %1273 = vst [vmem:[%s2287_s8 + $0x70] sm:$0xff] %v1237_v42  ;;  %v347_v42 = vperm.slane %v312_v19, 4 }
  0xff   : > { %1274 = vst [vmem:[%s2287_s8 + $0x78] sm:$0xff] %v1238_v44 }
 0x101   : > { %v948_v47 = vpop.f32.mrf.mxu2  ;;  %v961_v48 = vpop.f32.mrf.mxu3 }
 0x102   : > { %v972_v49 = vpop.f32.mrf.mxu0  ;;  %v985_v51 = vpop.f32.mrf.mxu1 }
 0x103   : > { %v973_v50 = vadd.f32 %v972_v49, %v335_v45  ;;  %v986_v23 = vadd.f32 %v985_v51, %v336_v46 }
 0x105   : > { %v1239_v52 = vmax.f32 %v973_v50, 0.0  ;;  %v1240_v53 = vmax.f32 %v986_v23, 0.0  ;;  %v349_v23 = vperm.slane %v312_v19, 6 }
 0x107   : > { %1275 = vst [vmem:[%s2287_s8 + $0x80] sm:$0xff] %v1239_v52  ;;  %v350_v52 = vperm.slane %v312_v19, 7 }
 0x108   : > { %1276 = vst [vmem:[%s2287_s8 + $0x88] sm:$0xff] %v1240_v53 }
 0x109   : > { %v998_v56 = vpop.f32.mrf.mxu2  ;;  %v1011_v58 = vpop.f32.mrf.mxu3 }
 0x10a   : > { %v999_v57 = vadd.f32 %v998_v56, %v337_v54  ;;  %v974_v59 = vpop.f32.mrf.mxu0  ;;  %v1012_v60 = vadd.f32 %v1011_v58, %v338_v55  ;;  %v987_v61 = vpop.f32.mrf.mxu1 }
 0x10c   : > { %v1241_v62 = vmax.f32 %v999_v57, 0.0  ;;  %v1242_v63 = vmax.f32 %v1012_v60, 0.0  ;;  %v313_v60 = vld [vmem:[%s2062_s25 + $0x20] sm:$0xf] }
 0x10e   : > { %1277 = vst [vmem:[%s2287_s8 + $0x90] sm:$0xff] %v1241_v62  ;;  %v351_v62 = vperm.slane %v313_v60, 0 }
 0x10f   : > { %1278 = vst [vmem:[%s2287_s8 + $0x98] sm:$0xff] %v1242_v63  ;;  %v352_v63 = vperm.slane %v313_v60, 1 }
 0x111   : > { %v1000_v2 = vpop.f32.mrf.mxu2  ;;  %v1013_v3 = vpop.f32.mrf.mxu3 }
 0x112   : > { %v1024_v4 = vpop.f32.mrf.mxu0  ;;  %v1037_v6 = vpop.f32.mrf.mxu1 }
 0x113   : > { %v1025_v5 = vadd.f32 %v1024_v4, %v339_v0  ;;  %v1038_v7 = vadd.f32 %v1037_v6, %v340_v1 }
 0x115   : > { %v1243_v8 = vmax.f32 %v1025_v5, 0.0  ;;  %v1244_v9 = vmax.f32 %v1038_v7, 0.0 }
 0x117   : > { %1279 = vst [vmem:[%s2287_s8 + $0xa0] sm:$0xff] %v1243_v8  ;;  %v353_v8 = vperm.slane %v313_v60, 2 }
 0x118   : > { %1280 = vst [vmem:[%s2287_s8 + $0xa8] sm:$0xff] %v1244_v9  ;;  %v354_v9 = vperm.slane %v313_v60, 3 }
 0x119   : > { %v1050_v12 = vpop.f32.mrf.mxu2  ;;  %v1063_v14 = vpop.f32.mrf.mxu3 }
 0x11a   : > { %v1051_v13 = vadd.f32 %v1050_v12, %v341_v10  ;;  %v1026_v15 = vpop.f32.mrf.mxu0  ;;  %v1064_v16 = vadd.f32 %v1063_v14, %v342_v11  ;;  %v1039_v17 = vpop.f32.mrf.mxu1 }
 0x11c   : > { %v1245_v18 = vmax.f32 %v1051_v13, 0.0  ;;  %v1246_v20 = vmax.f32 %v1064_v16, 0.0 }
 0x11e   : > { %1281 = vst [vmem:[%s2287_s8 + $0xb0] sm:$0xff] %v1245_v18 }
 0x11f   : > { %1282 = vst [vmem:[%s2287_s8 + $0xb8] sm:$0xff] %v1246_v20 }
 0x121   : > { %v1052_v24 = vpop.f32.mrf.mxu2  ;;  %v1065_v25 = vpop.f32.mrf.mxu3 }
 0x122   : > { %v1076_v26 = vpop.f32.mrf.mxu0  ;;  %v1089_v28 = vpop.f32.mrf.mxu1 }
 0x123   : > { %v1077_v27 = vadd.f32 %v1076_v26, %v343_v21  ;;  %v1090_v29 = vadd.f32 %v1089_v28, %v344_v22 }
 0x125   : > { %v1247_v30 = vmax.f32 %v1077_v27, 0.0  ;;  %v1248_v31 = vmax.f32 %v1090_v29, 0.0 }
 0x127   : > { %1283 = vst [vmem:[%s2287_s8 + $0xc0] sm:$0xff] %v1247_v30 }
 0x128   : > { %1284 = vst [vmem:[%s2287_s8 + $0xc8] sm:$0xff] %v1248_v31 }
 0x129   : > { %v1102_v34 = vpop.f32.mrf.mxu2  ;;  %v1115_v36 = vpop.f32.mrf.mxu3 }
 0x12a   : > { %v1103_v35 = vadd.f32 %v1102_v34, %v345_v32  ;;  %v1078_v37 = vpop.f32.mrf.mxu0  ;;  %v1116_v38 = vadd.f32 %v1115_v36, %v346_v33  ;;  %v1091_v39 = vpop.f32.mrf.mxu1 }
 0x12c   : > { %v1249_v40 = vmax.f32 %v1103_v35, 0.0  ;;  %v1250_v41 = vmax.f32 %v1116_v38, 0.0 }
 0x12e   : > { %1285 = vst [vmem:[%s2287_s8 + $0xd0] sm:$0xff] %v1249_v40 }
 0x12f   : > { %1286 = vst [vmem:[%s2287_s8 + $0xd8] sm:$0xff] %v1250_v41 }
 0x131   : > { %v1104_v44 = vpop.f32.mrf.mxu2  ;;  %v1117_v45 = vpop.f32.mrf.mxu3 }
 0x132   : > { %v1128_v46 = vpop.f32.mrf.mxu0  ;;  %v1141_v48 = vpop.f32.mrf.mxu1 }
 0x133   : > { %v1129_v47 = vadd.f32 %v1128_v46, %v347_v42  ;;  %v1142_v49 = vadd.f32 %v1141_v48, %v348_v43 }
 0x135   : > { %v1251_v50 = vmax.f32 %v1129_v47, 0.0  ;;  %v1252_v51 = vmax.f32 %v1142_v49, 0.0 }
 0x137   : > { %1287 = vst [vmem:[%s2287_s8 + $0xe0] sm:$0xff] %v1251_v50 }
 0x138   : > { %1288 = vst [vmem:[%s2287_s8 + $0xe8] sm:$0xff] %v1252_v51 }
 0x139   : > { %v1154_v53 = vpop.f32.mrf.mxu2  ;;  %v1167_v55 = vpop.f32.mrf.mxu3 }
 0x13a   : > { %v1155_v54 = vadd.f32 %v1154_v53, %v349_v23  ;;  %v1130_v56 = vpop.f32.mrf.mxu0  ;;  %v1168_v57 = vadd.f32 %v1167_v55, %v350_v52  ;;  %v1143_v58 = vpop.f32.mrf.mxu1 }
 0x13c   : > { %v1253_v59 = vmax.f32 %v1155_v54, 0.0  ;;  %v1254_v61 = vmax.f32 %v1168_v57, 0.0 }
 0x13e   : > { %1289 = vst [vmem:[%s2287_s8 + $0xf0] sm:$0xff] %v1253_v59 }
 0x13f   : > { %1290 = vst [vmem:[%s2287_s8 + $0xf8] sm:$0xff] %v1254_v61 }
 0x141   : > { %v1156_v0 = vpop.f32.mrf.mxu2  ;;  %v1169_v1 = vpop.f32.mrf.mxu3 }
 0x142   : > { %v1180_v2 = vpop.f32.mrf.mxu0  ;;  %v1193_v4 = vpop.f32.mrf.mxu1 }
 0x143   : > { %v1181_v3 = vadd.f32 %v1180_v2, %v351_v62  ;;  %v1194_v5 = vadd.f32 %v1193_v4, %v352_v63 }
 0x145   : > { %v1255_v6 = vmax.f32 %v1181_v3, 0.0  ;;  %v1256_v7 = vmax.f32 %v1194_v5, 0.0 }
 0x147   : > { %1291 = vst [vmem:[%s2287_s8 + $0x100] sm:$0xff] %v1255_v6 }
 0x148   : > { %1292 = vst [vmem:[%s2287_s8 + $0x108] sm:$0xff] %v1256_v7 }
 0x149   : > { %v1206_v10 = vpop.f32.mrf.mxu2  ;;  %v1219_v12 = vpop.f32.mrf.mxu3 }
 0x14a   : > { %v1207_v11 = vadd.f32 %v1206_v10, %v353_v8  ;;  %v1182_v13 = vpop.f32.mrf.mxu0  ;;  %v1220_v14 = vadd.f32 %v1219_v12, %v354_v9  ;;  %v1195_v15 = vpop.f32.mrf.mxu1 }
 0x14c   : > { %v1257_v16 = vmax.f32 %v1207_v11, 0.0  ;;  %v1258_v17 = vmax.f32 %v1220_v14, 0.0 }
 0x14e   : > { %1293 = vst [vmem:[%s2287_s8 + $0x110] sm:$0xff] %v1257_v16 }
 0x14f   : > { %1294 = vst [vmem:[%s2287_s8 + $0x118] sm:$0xff] %v1258_v17 }
 0x151   : > { %v1208_v18 = vpop.f32.mrf.mxu2  ;;  %v1221_v19 = vpop.f32.mrf.mxu3 }
 0x152 PF: > { %p16_p8 = scmp.ge.s32.totalorder %s1985_s17, 4   ;;  %s2357_s12 = smov %s1932_s13 }
 0x153   : > { %s2358_s13 = smov %s1936_s14  ;;  %s2359_s14 = smov %s1995_s20 }
 0x154   : > { %s2360_s15 = smov %s1985_s17  ;;  %18 = sbr.rel (!%p16_p8) target bundleno = 5 (0x5), region = 85 }
 0x159   :  { %1317 = vsyncpa [#allocation3], 1 }
 0x15a   :  { %1319 = vsyncpa [#allocation3 + $0x1], 1 }
 0x15b   :  { %1320 = vsyncpa [#allocation5], 1 }
 0x15c   :  { %1322 = vsyncpa [#allocation5 + $0x1], 1 }

</bundles_post_ra>
